<compile_context>
chip_gen: v6e
topology: v6e:2x2x1
jax: 0.10.0
libtpu: 0.0.40
codegen_flags: <defaults>
</compile_context>

<pallas_src>
import jax
import jax.numpy as jnp
from jax import lax
from jax.experimental import pallas as pl
from jax.experimental.pallas import tpu as pltpu


def l_kernel(z_ref, o_ref):
    """Block (i, j): copy below diag, masked |diag| on diag, zeros above."""
    i = pl.program_id(0)
    j = pl.program_id(1)

    @pl.when(j < i)
    def _():
        # Strictly below the diagonal: straight lane-dense copy.
        o_ref[...] = z_ref[...]

    @pl.when(j == i)
    def _():
        # Diagonal block: local iotas suffice (global row == global col here).
        z = z_ref[...]
        m, n = z.shape
        diff = (lax.broadcasted_iota(jnp.int32, (m, n), 0)
                - lax.broadcasted_iota(jnp.int32, (m, n), 1))
        o_ref[...] = jnp.where(
            diff > 0, z, jnp.where(diff == 0, jnp.abs(z), jnp.zeros_like(z))
        )

    @pl.when(j > i)
    def _():
        # Above the diagonal: never read z_ref (its DMA was skipped anyway).
        o_ref[...] = jnp.zeros_like(o_ref)


def _budgets():
    """(max_tile_bytes, vmem_limit_bytes) tuned per TPU generation."""
    try:
        kind = jax.devices()[0].device_kind.lower()
    except Exception:  # pragma: no cover - defensive
        kind = ""
    if ("v5" in kind or "v6" in kind) and "v7" not in kind:
        # 128 MiB VMEM: allow bigger tiles to cut grid-step overhead.
        return 8 * 1024 * 1024, 64 * 1024 * 1024
    # v7x (64 MiB VMEM/TC) or unknown: stay conservative.
    return 4 * 1024 * 1024, 32 * 1024 * 1024


def _pick_tile(n, itemsize, max_tile_bytes):
    """Square tile edge: multiple of 128 (lane-dense), within the byte budget."""
    if n <= 128:
        return n  # single full-array block (block == full dims is allowed)
    cap_elems = max(128 * 128, max_tile_bytes // itemsize)
    tm = 128
    while tm + 128 <= n and (tm + 128) * (tm + 128) <= cap_elems:
        tm += 128
    return tm


def l_forward(z, tm=None):
    """Map an unconstrained square matrix to lower-triangular with non-negative
    main diagonal (Pallas TPU kernel, 2-D tiled with upper-triangle DMA skip)."""
    assert z.ndim == 2 and z.shape[0] == z.shape[1], "Z must be square"
    n = z.shape[0]
    itemsize = jnp.dtype(z.dtype).itemsize
    max_tile_bytes, vmem_limit = _budgets()
    if tm is None:
        tm = _pick_tile(n, itemsize, max_tile_bytes)
    nb = pl.cdiv(n, tm)

    return pl.pallas_call(
        l_kernel,
        out_shape=jax.ShapeDtypeStruct((n, n), z.dtype),
        grid=(nb, nb),
        in_specs=[
            # Clamp the column block index so above-diagonal steps reuse the
            # resident diagonal block (DMA skipped on revisits).
            pl.BlockSpec((tm, tm), lambda i, j: (i, jnp.minimum(j, i))),
        ],
        out_specs=pl.BlockSpec((tm, tm), lambda i, j: (i, j)),
        compiler_params=pltpu.CompilerParams(
            dimension_semantics=("parallel", "arbitrary"),
            vmem_limit_bytes=vmem_limit,
        ),
        cost_estimate=pl.CostEstimate(
            flops=0,
            transcendentals=0,
            bytes_accessed=int(1.5 * n * n * itemsize),
        ),
    )(z)


def l_reference(z):
    return jnp.tril(z, -1) + jnp.diag(jnp.abs(jnp.diag(z)))


if __name__ == "__main__":
    key = jax.random.PRNGKey(0)

    # Small single-block case (module L has no parameters; only Z is needed).
    n = 16
    z = jax.random.normal(key, (n, n), dtype=jnp.float32)
    out = jax.block_until_ready(l_forward(z))
    ref = l_reference(z)
    assert out.shape == ref.shape and out.dtype == ref.dtype
    assert jnp.allclose(out, ref), "mismatch vs. reference (single block)"

    # Multi-tile path: exercises copy / diag / zero block specialization and
    # the clamped-column input index_map across a 2x2 grid.
    n2 = 256
    z2 = jax.random.normal(jax.random.fold_in(key, 1), (n2, n2), dtype=jnp.float32)
    out2 = jax.block_until_ready(l_forward(z2, tm=128))
    ref2 = l_reference(z2)
    assert jnp.allclose(out2, ref2), "mismatch vs. reference (tiled f32)"

    # Ragged N (not a multiple of the 128 tile): cdiv grid + edge masking.
    n3 = 200
    z3 = jax.random.normal(jax.random.fold_in(key, 2), (n3, n3), dtype=jnp.float32)
    out3 = jax.block_until_ready(l_forward(z3, tm=128))
    ref3 = l_reference(z3)
    assert jnp.allclose(out3, ref3), "mismatch vs. reference (ragged f32)"

    # bf16 path: packed-sublane layout with the same 128-multiple tiles.
    n4 = 256
    z4 = jax.random.normal(jax.random.fold_in(key, 3), (n4, n4)).astype(jnp.bfloat16)
    out4 = jax.block_until_ready(l_forward(z4, tm=128))
    ref4 = l_reference(z4)
    assert jnp.allclose(out4.astype(jnp.float32), ref4.astype(jnp.float32)), (
        "mismatch vs. reference (tiled bf16)"
    )

    print("KERNEL_OK")
</pallas_src>

<mosaic_0001>
module attributes {stable_mosaic.version = 11 : i64} {
  func.func @l_kernel(%arg0: i32, %arg1: i32, %arg2: memref<16x16xf32, #tpu.memory_space<vmem>>, %arg3: memref<16x16xf32, #tpu.memory_space<vmem>>) attributes {dimension_semantics = [#tpu.dimension_semantics<parallel>, #tpu.dimension_semantics<arbitrary>], iteration_bounds = array<i64: 1, 1>, scalar_prefetch = 0 : i64, scratch_operands = 0 : i64, tpu.core_type = #tpu.core_type<tc>, window_params = [{transform_indices = @transform_0, window_bounds = array<i64: 16, 16>}, {transform_indices = @transform_1, window_bounds = array<i64: 16, 16>}]} {
    %0 = arith.cmpi slt, %arg1, %arg0 : i32
    %1 = arith.extui %0 : i1 to i32
    %c0_i32 = arith.constant 0 : i32
    %2 = arith.cmpi ne, %1, %c0_i32 : i32
    scf.if %2 {
      %c0 = arith.constant 0 : index
      %c0_2 = arith.constant 0 : index
      %9 = vector.load %arg2[%c0, %c0_2] : memref<16x16xf32, #tpu.memory_space<vmem>>, vector<16x16xf32>
      %c0_3 = arith.constant 0 : index
      %c0_4 = arith.constant 0 : index
      %10 = vector.load %arg3[%c0_3, %c0_4] : memref<16x16xf32, #tpu.memory_space<vmem>>, vector<16x16xf32>
      tpu.vector_store %arg3[%c0_3, %c0_4], %9 {strides = array<i32>} : memref<16x16xf32, #tpu.memory_space<vmem>>, vector<16x16xf32>,
    } else {
    }
    %3 = arith.cmpi eq, %arg1, %arg0 : i32
    %4 = arith.extui %3 : i1 to i32
    %c0_i32_0 = arith.constant 0 : i32
    %5 = arith.cmpi ne, %4, %c0_i32_0 : i32
    scf.if %5 {
      %c0 = arith.constant 0 : index
      %c0_2 = arith.constant 0 : index
      %9 = vector.load %arg2[%c0, %c0_2] : memref<16x16xf32, #tpu.memory_space<vmem>>, vector<16x16xf32>
      %10 = tpu.iota {dimensions = array<i32: 0>} : vector<16x16xi32>
      %11 = tpu.iota {dimensions = array<i32: 1>} : vector<16x16xi32>
      %12 = arith.subi %10, %11 : vector<16x16xi32>
      %c0_i32_3 = arith.constant 0 : i32
      %13 = vector.broadcast %c0_i32_3 : i32 to vector<16x16xi32>
      %14 = arith.cmpi sgt, %12, %13 : vector<16x16xi32>
      %c0_i32_4 = arith.constant 0 : i32
      %15 = vector.broadcast %c0_i32_4 : i32 to vector<16x16xi32>
      %16 = arith.cmpi eq, %12, %15 : vector<16x16xi32>
      %17 = math.absf %9 : vector<16x16xf32>
      %cst = arith.constant 0.000000e+00 : f32
      %18 = vector.broadcast %cst : f32 to vector<16x16xf32>
      %19 = arith.select %16, %17, %18 : vector<16x16xi1>, vector<16x16xf32>
      %20 = arith.select %14, %9, %19 : vector<16x16xi1>, vector<16x16xf32>
      %c0_5 = arith.constant 0 : index
      %c0_6 = arith.constant 0 : index
      %21 = vector.load %arg3[%c0_5, %c0_6] : memref<16x16xf32, #tpu.memory_space<vmem>>, vector<16x16xf32>
      tpu.vector_store %arg3[%c0_5, %c0_6], %20 {strides = array<i32>} : memref<16x16xf32, #tpu.memory_space<vmem>>, vector<16x16xf32>,
    } else {
    }
    %6 = arith.cmpi sgt, %arg1, %arg0 : i32
    %7 = arith.extui %6 : i1 to i32
    %c0_i32_1 = arith.constant 0 : i32
    %8 = arith.cmpi ne, %7, %c0_i32_1 : i32
    scf.if %8 {
      %cst = arith.constant 0.000000e+00 : f32
      %9 = vector.broadcast %cst : f32 to vector<16x16xf32>
      %c0 = arith.constant 0 : index
      %c0_2 = arith.constant 0 : index
      %10 = vector.load %arg3[%c0, %c0_2] : memref<16x16xf32, #tpu.memory_space<vmem>>, vector<16x16xf32>
      tpu.vector_store %arg3[%c0, %c0_2], %9 {strides = array<i32>} : memref<16x16xf32, #tpu.memory_space<vmem>>, vector<16x16xf32>,
    } else {
    }
    return
  }
  func.func @transform_0(%arg0: i32, %arg1: i32) -> (i32, i32) {
    %0 = arith.minsi %arg1, %arg0 : i32
    %c0_i32 = arith.constant 0 : i32
    return %arg0, %0 : i32, i32
  }
  func.func @transform_1(%arg0: i32, %arg1: i32) -> (i32, i32) {
    %c0_i32 = arith.constant 0 : i32
    return %arg0, %arg1 : i32, i32
  }
}

</mosaic_0001>

<bundles_post_ra>
// kernel: tpu_custom_call.1
= control target key start
LH: loop header
LB: loop body
LE: loop exit
PB: predicated region body
PF: predicated region fallthrough
CT: control target
= control target key end

     0   :  { %6 = vsyncpa [#allocation3], 0  ;;  %s156_s0 = inlined_call_operand.hbm [shape: f32[16,16], index: 0, kind: input, shape index: {}]   ;;  %s157_s1 = inlined_call_operand.hbm [shape: f32[16,16], index: 1, kind: output, shape index: {}]  }
   0x1   :  { %7 = vsyncpa [#allocation4], 0  ;;  %s130_s6 = smov [#allocation2]  }
   0x2   :  { %s13_s7 = sshll.u32 %s130_s6, 4  ;;  %s14_s7 = int_to_ptr.vmem [resolvable:$true] %s13_s7 }
   0x3   :  { %s94_s8 = scalar_lea.vmem %s14_s7, 256  ;;  %p99_p1 = scmp.lt.s32.totalorder %s14_s7, %s14_s7 }
   0x4   :  { %p95_p0 = scmp.ne.s32.totalorder %s14_s7, %s94_s8  ;;  %p100_p2 = scmp.lt.s32.totalorder %s94_s8, %s94_s8 }
   0x6   :  { %p101_p3 = por %p100_p2, %p99_p1 }
   0x8   :  { %p102_p4 = pnand %p101_p3, %p95_p0 }
   0xa   :  { %105 = shalt.err (!%p102_p4)
}
   0xb   :  { %s131_s9 = smov 128   ;;  %s132_s10 = smov 8  }
   0xc   :  { %19 = dma.hbm_to_vmem [thread:$0]  %s156_s0, 256, %s14_s7, [#allocation3], %s131_s9, %s131_s9, %s132_s10  }
   0xd   :  { %126 = dma.done.wait [#allocation3], 256  }
   0xe   :  { %127 = vsyncadd [#allocation3], 4294967040  ;;  %v38_v0 = vlaneseq  ;;  %v36_v6 = vld [vmem:[#allocation2] sm:$0xff]  ;;  %v37_v7 = vld [vmem:[#allocation2 + $0x8] sm:$0xff]  ;;  %s133_s13 = smov [#allocation5]   ;;  %vm55_vm4 = vcmask 130048  }
   0xf   :  { %s70_s14 = sshll.u32 %s133_s13, 4  ;;  %v49_v8 = vand.u32 2147483647, %v36_v6  ;;  %v50_v9 = vand.u32 2147483647, %v37_v7  ;;  %s71_s14 = int_to_ptr.vmem [resolvable:$true] %s70_s14 }
  0x10   :  { %v39_v1 = vshrl.u32 %v38_v0, 7  ;;  %v42_v2 = vand.u32 127, %v38_v0  ;;  %s106_s0 = scalar_lea.vmem %s71_s14, 256  ;;  %p111_p6 = scmp.lt.s32.totalorder %s71_s14, %s71_s14 }
  0x11   :  { %p107_p5 = scmp.ne.s32.totalorder %s71_s14, %s106_s0  ;;  %p112_p7 = scmp.lt.s32.totalorder %s106_s0, %s106_s0 }
  0x12   :  { %v43_v3 = vsub.s32 %v39_v1, %v42_v2  ;;  %v40_v4 = vadd.s32 8, %v39_v1 }
  0x13   :  { %p113_p8 = por %p112_p7, %p111_p6 }
  0x14   :  { %v44_v5 = vsub.s32 %v40_v4, %v42_v2  ;;  %vm45_vm0 = vcmp.gt.s32.totalorder %v43_v3, 0  ;;  %vm47_vm1 = vcmp.eq.s32.totalorder %v43_v3, 0 }
  0x15   :  { %v51_v10 = vsel %vm47_vm1, %v49_v8, 0.0  ;;  %p114_p9 = pnand %p113_p8, %p107_p5 }
  0x16   :  { %vm46_vm2 = vcmp.gt.s32.totalorder %v44_v5, 0  ;;  %vm48_vm3 = vcmp.eq.s32.totalorder %v44_v5, 0  ;;  %v53_v12 = vsel %vm45_vm0, %v36_v6, %v51_v10 }
  0x17   :  { %v52_v11 = vsel %vm48_vm3, %v50_v9, 0.0  ;;  %56 = vst.msk [vmem:[#allocation5] sm:$0xff] %vm55_vm4, %v53_v12 }
  0x18   :  { %v54_v13 = vsel %vm46_vm2, %v37_v7, %v52_v11 }
  0x19   :  { %57 = vst.msk [vmem:[#allocation5 + $0x8] sm:$0xff] %vm55_vm4, %v54_v13 }
  0x1a   :  { %117 = shalt.err (!%p114_p9)
}
  0x1b   :  { %76 = dma.vmem_to_hbm [thread:$0]  %s71_s14, 256, %s157_s1, [#allocation4], %s131_s9, %s131_s9, %s132_s10  }
  0x1c   :  { %128 = dma.done.wait [#allocation4], 256  }
  0x1d   :  { %129 = vsyncadd [#allocation4], 4294967040 }
  0x1e   :  { %80 = vsyncpa [#allocation3], 1 }
  0x1f   :  { %81 = vsyncpa [#allocation4], 1 }

</bundles_post_ra>
